<compile_context>
chip_gen: v5e
topology: v5e:2x2
jax: 0.10.0
libtpu: 0.0.40
codegen_flags: <defaults>
</compile_context>

<pallas_src>
import functools

import jax
import jax.numpy as jnp
import numpy as np
from jax.experimental import pallas as pl
from jax.experimental.pallas import tpu as pltpu


def _round_up(x, m):
    return (x + m - 1) // m * m


def _nbytes(a):
    return int(np.prod(a.shape)) * int(np.dtype(a.dtype).itemsize)


def _pick_vmem_limit(resident_bytes):
    """Explicit scoped-VMEM request sized to the kernel, capped by hardware."""
    try:
        physical = int(pltpu.get_tpu_info().vmem_capacity_bytes)
    except Exception:
        physical = 64 * 1024 * 1024  # assume the smallest per-core VMEM (v7x)
    want = 2 * int(resident_bytes) + (4 << 20)
    return int(min(max(want, 32 << 20), (physical * 3) // 4))


# --------------------------------------------------------------------------
# Kernels
# --------------------------------------------------------------------------

def _onehot_fused_kernel(idx_ref, t1_ref, b1_ref, wms_ref, bms_ref, out_ref):
    """Small-vocab path: one block-diagonal one-hot matmul (FC_1 pre-folded).

    idx_ref : [bb, D]        int32  (category index + per-domain vocab offset)
    t1_ref  : [Vt_p, F_p]    f32/bf16   block_diag(tables) @ W1, zero-padded
    b1_ref  : [1, F_p]       f32
    wms_ref : [F_p, Z2_p]    f32/bf16   (Wmu | Wsig | zero pad)
    bms_ref : [1, Z2_p]      f32
    out_ref : [bb, Z2_p]     f32        tanh( mu | log_var | pad )
    """
    bb, num_domains = idx_ref.shape
    vt_p = t1_ref.shape[0]

    # Combined one-hot: one [bb, Vt_p] mask with D disjoint hits per row.
    lane = jax.lax.broadcasted_iota(jnp.int32, (bb, vt_p), 1)
    hit = lane == idx_ref[:, 0][:, None]
    for d in range(1, num_domains):
        hit = jnp.logical_or(hit, lane == idx_ref[:, d][:, None])
    one_hot = hit.astype(t1_ref.dtype)   # 0/1 exact in bf16 too

    # Embedding gather + FC_1 in a single MXU pass (table already folded).
    x1 = jnp.dot(one_hot, t1_ref[...],
                 preferred_element_type=jnp.float32) + b1_ref[...]

    # Fused FC_mu | FC_sigma + Tanh, lane-dense store.
    out_ref[...] = jnp.tanh(
        jnp.dot(x1.astype(wms_ref.dtype), wms_ref[...],
                preferred_element_type=jnp.float32) + bms_ref[...]
    )


def _gather_fused_kernel(xemb_ref, w1_ref, b1_ref, wms_ref, bms_ref, out_ref):
    """Large-vocab path: embeddings gathered in the XLA wrapper.

    xemb_ref : [bb, In_p]   f32/bf16 (zero-padded concat of embeddings)
    w1_ref   : [In_p, F_p]  f32/bf16
    b1_ref   : [1, F_p]     f32
    wms_ref  : [F_p, Z2_p]  f32/bf16
    bms_ref  : [1, Z2_p]    f32
    out_ref  : [bb, Z2_p]   f32
    """
    x1 = jnp.dot(xemb_ref[...], w1_ref[...],
                 preferred_element_type=jnp.float32) + b1_ref[...]
    out_ref[...] = jnp.tanh(
        jnp.dot(x1.astype(wms_ref.dtype), wms_ref[...],
                preferred_element_type=jnp.float32) + bms_ref[...]
    )


# --------------------------------------------------------------------------
# Parameter fusion (one-time; embedding tables are frozen in the module)
# --------------------------------------------------------------------------

def build_encoder_params(emb_tables, w1, b1, wmu, bmu, wsig, bsig, *,
                         use_bf16=True, vocab_threshold=2048):
    vocab_sizes = [int(t.shape[0]) for t in emb_tables]
    emb_dim = int(emb_tables[0].shape[1])
    num_domains = len(emb_tables)
    v_total = sum(vocab_sizes)
    in_dim = emb_dim * num_domains
    fc0 = int(w1.shape[1])
    z_dim = int(wmu.shape[1])

    compute_dtype = jnp.bfloat16 if use_bf16 else jnp.float32

    lane = 128
    f_pad = _round_up(fc0, lane)
    z2_pad = _round_up(2 * z_dim, lane)

    # Fused, lane-dense-padded mu|sigma head.
    wms = np.zeros((f_pad, z2_pad), np.float32)
    wms[:fc0, :z_dim] = np.asarray(wmu, np.float32)
    wms[:fc0, z_dim:2 * z_dim] = np.asarray(wsig, np.float32)
    bms = np.zeros((1, z2_pad), np.float32)
    bms[0, :z_dim] = np.asarray(bmu, np.float32).reshape(-1)
    bms[0, z_dim:2 * z_dim] = np.asarray(bsig, np.float32).reshape(-1)

    b1_p = np.zeros((1, f_pad), np.float32)
    b1_p[0, :fc0] = np.asarray(b1, np.float32).reshape(-1)

    params = dict(
        num_domains=num_domains, z_dim=z_dim,
        b1=jnp.asarray(b1_p),
        wms=jnp.asarray(wms, compute_dtype),
        bms=jnp.asarray(bms),
    )

    if v_total <= vocab_threshold:
        # Small vocab: block-diagonal table with FC_1 folded in (T1 = BD @ W1).
        offsets = np.zeros((num_domains,), np.int32)
        combined = np.zeros((v_total, in_dim), np.float64)
        row = 0
        for d, t in enumerate(emb_tables):
            offsets[d] = row
            combined[row:row + vocab_sizes[d],
                     d * emb_dim:(d + 1) * emb_dim] = np.asarray(t, np.float64)
            row += vocab_sizes[d]
        t1 = combined @ np.asarray(w1, np.float64)          # [Vt, fc0] in f64
        vt_pad = _round_up(v_total, 8)                      # sublane multiple
        t1_p = np.zeros((vt_pad, f_pad), np.float32)
        t1_p[:v_total, :fc0] = t1.astype(np.float32)
        params.update(
            mode="onehot",
            offsets=jnp.asarray(offsets),
            t1=jnp.asarray(t1_p, compute_dtype),
        )
    else:
        # Large vocab: keep per-domain tables for an XLA-side gather; the
        # kernel only runs the (padded) FC stack.
        in_pad = _round_up(in_dim, lane)
        w1_p = np.zeros((in_pad, f_pad), np.float32)
        w1_p[:in_dim, :fc0] = np.asarray(w1, np.float32)
        params.update(
            mode="gather",
            emb_tables=tuple(jnp.asarray(t, compute_dtype) for t in emb_tables),
            w1=jnp.asarray(w1_p, compute_dtype),
        )
    return params


# --------------------------------------------------------------------------
# Forward wrappers
# --------------------------------------------------------------------------

@functools.partial(jax.jit, static_argnames=("z_dim", "block_cap"))
def _forward_onehot(x_idx, offsets, t1, b1, wms, bms, *, z_dim, block_cap=512):
    batch, num_domains = x_idx.shape
    vt_pad, f_pad = t1.shape
    z2_pad = wms.shape[1]

    # Fold per-domain vocab offsets into the indices (wrapper-side, free).
    idx_off = x_idx.astype(jnp.int32) + offsets[None, :]

    block_b = block_cap if batch > block_cap else _round_up(batch, 8)
    pad = (-batch) % block_b
    if pad:
        idx_off = jnp.pad(idx_off, ((0, pad), (0, 0)))
    padded = batch + pad
    grid = (padded // block_b,)

    resident = (2 * (_nbytes(t1) + _nbytes(b1) + _nbytes(wms) + _nbytes(bms))
                + 2 * block_b * (num_domains * 4 + z2_pad * 4)
                + block_b * (vt_pad + f_pad) * 4)

    out = pl.pallas_call(
        _onehot_fused_kernel,
        out_shape=jax.ShapeDtypeStruct((padded, z2_pad), jnp.float32),
        grid=grid,
        in_specs=[
            pl.BlockSpec((block_b, num_domains), lambda i: (i, 0)),  # indices
            pl.BlockSpec((vt_pad, f_pad), lambda i: (0, 0)),         # T1
            pl.BlockSpec((1, f_pad), lambda i: (0, 0)),              # b1
            pl.BlockSpec((f_pad, z2_pad), lambda i: (0, 0)),         # Wmu|Wsig
            pl.BlockSpec((1, z2_pad), lambda i: (0, 0)),             # bmu|bsig
        ],
        out_specs=pl.BlockSpec((block_b, z2_pad), lambda i: (i, 0)),
        compiler_params=pltpu.CompilerParams(
            dimension_semantics=("parallel",),
            vmem_limit_bytes=_pick_vmem_limit(resident)),
    )(idx_off, t1, b1, wms, bms)

    out = out[:batch]
    return out[:, :z_dim], out[:, z_dim:2 * z_dim]


@functools.partial(jax.jit, static_argnames=("z_dim", "block_cap"))
def _forward_gather(x_idx, emb_tables, w1, b1, wms, bms, *, z_dim, block_cap=512):
    batch, num_domains = x_idx.shape
    in_pad, f_pad = w1.shape
    z2_pad = wms.shape[1]

    # XLA-side embedding gather (large-vocab fallback; only B*D rows touched).
    embs = [jnp.take(emb_tables[d], x_idx[:, d], axis=0)
            for d in range(num_domains)]
    x_emb = jnp.concatenate(embs, axis=-1)
    in_dim = x_emb.shape[1]
    if in_pad != in_dim:
        x_emb = jnp.pad(x_emb, ((0, 0), (0, in_pad - in_dim)))
    x_emb = x_emb.astype(w1.dtype)

    block_b = block_cap if batch > block_cap else _round_up(batch, 8)
    pad = (-batch) % block_b
    if pad:
        x_emb = jnp.pad(x_emb, ((0, pad), (0, 0)))
    padded = batch + pad
    grid = (padded // block_b,)

    resident = (2 * (_nbytes(w1) + _nbytes(b1) + _nbytes(wms) + _nbytes(bms))
                + 2 * block_b * (in_pad * 4 + z2_pad * 4)
                + block_b * f_pad * 4)

    out = pl.pallas_call(
        _gather_fused_kernel,
        out_shape=jax.ShapeDtypeStruct((padded, z2_pad), jnp.float32),
        grid=grid,
        in_specs=[
            pl.BlockSpec((block_b, in_pad), lambda i: (i, 0)),  # x_emb
            pl.BlockSpec((in_pad, f_pad), lambda i: (0, 0)),    # W1
            pl.BlockSpec((1, f_pad), lambda i: (0, 0)),         # b1
            pl.BlockSpec((f_pad, z2_pad), lambda i: (0, 0)),    # Wmu|Wsig
            pl.BlockSpec((1, z2_pad), lambda i: (0, 0)),        # bmu|bsig
        ],
        out_specs=pl.BlockSpec((block_b, z2_pad), lambda i: (i, 0)),
        compiler_params=pltpu.CompilerParams(
            dimension_semantics=("parallel",),
            vmem_limit_bytes=_pick_vmem_limit(resident)),
    )(x_emb, w1, b1, wms, bms)

    out = out[:batch]
    return out[:, :z_dim], out[:, z_dim:2 * z_dim]


def encoder_forward(params, x_idx):
    if params["mode"] == "onehot":
        return _forward_onehot(x_idx, params["offsets"], params["t1"],
                               params["b1"], params["wms"], params["bms"],
                               z_dim=params["z_dim"])
    return _forward_gather(x_idx, params["emb_tables"], params["w1"],
                           params["b1"], params["wms"], params["bms"],
                           z_dim=params["z_dim"])


# --------------------------------------------------------------------------
# Pure-JAX reference (mirrors the intended PyTorch forward)
# --------------------------------------------------------------------------

def _reference_forward(x_idx, emb_tables, w1, b1, wmu, bmu, wsig, bsig):
    embs = [jnp.take(emb_tables[i], x_idx[:, i], axis=0)
            for i in range(len(emb_tables))]
    x_emb = jnp.concatenate(embs, axis=-1)
    x1 = x_emb @ w1 + b1
    mu = jnp.tanh(x1 @ wmu + bmu)
    log_var = jnp.tanh(x1 @ wsig + bsig)
    return mu, log_var


if __name__ == "__main__":
    # Small, forward-consistent configuration.
    domain_dims = (11, 7, 13)          # vocab size per domain
    num_domains = len(domain_dims)
    emb_dim = 16
    fc_layer_dims = (64, 64)           # must be equal for the forward to work
    z_dim = 32
    batch = 8

    key = jax.random.PRNGKey(0)
    keys = jax.random.split(key, num_domains + 6 + num_domains)

    # Frozen embedding tables (stand-in for init_emb_weights numpy arrays).
    emb_tables = tuple(
        jax.random.normal(keys[i], (domain_dims[i], emb_dim), jnp.float32) * 0.1
        for i in range(num_domains)
    )

    in_dim = emb_dim * num_domains
    kw = keys[num_domains:]

    def linear_params(kw_w, kw_b, fan_in, fan_out):
        bound = 1.0 / np.sqrt(fan_in)
        w = jax.random.uniform(kw_w, (fan_in, fan_out), jnp.float32,
                               minval=-bound, maxval=bound)     # == torch W.T
        b = jax.random.uniform(kw_b, (1, fan_out), jnp.float32,
                               minval=-bound, maxval=bound)
        return w, b

    w1, b1 = linear_params(kw[0], kw[1], in_dim, fc_layer_dims[0])
    wmu, bmu = linear_params(kw[2], kw[3], fc_layer_dims[1], z_dim)
    wsig, bsig = linear_params(kw[4], kw[5], fc_layer_dims[1], z_dim)

    # Integer category indices per domain.
    x_cols = [
        jax.random.randint(kw[6 + d], (batch, 1), 0, domain_dims[d], jnp.int32)
        for d in range(num_domains)
    ]
    x_idx = jnp.concatenate(x_cols, axis=-1)               # [batch, num_domains]

    mu_ref, lv_ref = _reference_forward(
        x_idx, emb_tables, w1, b1, wmu, bmu, wsig, bsig)

    # (1) Exact f32 weights, folded one-hot path -> tight tolerance.
    p_f32 = build_encoder_params(emb_tables, w1, b1, wmu, bmu, wsig, bsig,
                                 use_bf16=False)
    mu, lv = encoder_forward(p_f32, x_idx)
    jax.block_until_ready((mu, lv))
    np.testing.assert_allclose(np.asarray(mu), np.asarray(mu_ref),
                               rtol=1e-4, atol=1e-4)
    np.testing.assert_allclose(np.asarray(lv), np.asarray(lv_ref),
                               rtol=1e-4, atol=1e-4)

    # (2) bf16 weights/table (MXU fast path), folded one-hot path.
    p_bf16 = build_encoder_params(emb_tables, w1, b1, wmu, bmu, wsig, bsig,
                                  use_bf16=True)
    mu, lv = encoder_forward(p_bf16, x_idx)
    jax.block_until_ready((mu, lv))
    np.testing.assert_allclose(np.asarray(mu), np.asarray(mu_ref),
                               rtol=2e-2, atol=2e-2)
    np.testing.assert_allclose(np.asarray(lv), np.asarray(lv_ref),
                               rtol=2e-2, atol=2e-2)

    # (3) Large-vocab gather fallback (forced here via vocab_threshold=0).
    p_gather = build_encoder_params(emb_tables, w1, b1, wmu, bmu, wsig, bsig,
                                    use_bf16=True, vocab_threshold=0)
    mu, lv = encoder_forward(p_gather, x_idx)
    jax.block_until_ready((mu, lv))
    np.testing.assert_allclose(np.asarray(mu), np.asarray(mu_ref),
                               rtol=2e-2, atol=2e-2)
    np.testing.assert_allclose(np.asarray(lv), np.asarray(lv_ref),
                               rtol=2e-2, atol=2e-2)

    # TODO(synk): nn.Dropout is declared in __init__ but never applied in
    # forward, so it is intentionally omitted here.
    print("KERNEL_OK")
</pallas_src>

<mosaic_0001>
module attributes {stable_mosaic.version = 11 : i64} {
  func.func @_onehot_fused_kernel(%arg0: i32, %arg1: memref<8x3xi32, #tpu.memory_space<vmem>>, %arg2: memref<32x128xf32, #tpu.memory_space<vmem>>, %arg3: memref<1x128xf32, #tpu.memory_space<vmem>>, %arg4: memref<128x128xf32, #tpu.memory_space<vmem>>, %arg5: memref<1x128xf32, #tpu.memory_space<vmem>>, %arg6: memref<8x128xf32, #tpu.memory_space<vmem>>) attributes {dimension_semantics = [#tpu.dimension_semantics<parallel>], iteration_bounds = array<i64: 1>, scalar_prefetch = 0 : i64, scratch_operands = 0 : i64, tpu.core_type = #tpu.core_type<tc>, window_params = [{transform_indices = @transform_0, window_bounds = array<i64: 8, 3>}, {pipeline_mode = #tpu.pipeline_mode<synchronous>, transform_indices = @transform_1, window_bounds = array<i64: 32, 128>}, {pipeline_mode = #tpu.pipeline_mode<synchronous>, transform_indices = @transform_2, window_bounds = array<i64: 1, 128>}, {pipeline_mode = #tpu.pipeline_mode<synchronous>, transform_indices = @transform_3, window_bounds = array<i64: 128, 128>}, {pipeline_mode = #tpu.pipeline_mode<synchronous>, transform_indices = @transform_4, window_bounds = array<i64: 1, 128>}, {transform_indices = @transform_5, window_bounds = array<i64: 8, 128>}]} {
    %0 = tpu.iota {dimensions = array<i32: 1>} : vector<8x32xi32>
    %c0 = arith.constant 0 : index
    %c0_0 = arith.constant 0 : index
    %1 = vector.load %arg1[%c0, %c0_0] : memref<8x3xi32, #tpu.memory_space<vmem>>, vector<8x1xi32>
    %2 = vector.shape_cast %1 : vector<8x1xi32> to vector<8xi32>
    %3 = vector.shape_cast %2 : vector<8xi32> to vector<8x1xi32>
    %4 = vector.broadcast %3 : vector<8x1xi32> to vector<8x32xi32>
    %5 = arith.cmpi eq, %0, %4 : vector<8x32xi32>
    %c0_1 = arith.constant 0 : index
    %c1 = arith.constant 1 : index
    %6 = vector.load %arg1[%c0_1, %c1] : memref<8x3xi32, #tpu.memory_space<vmem>>, vector<8x1xi32>
    %7 = vector.shape_cast %6 : vector<8x1xi32> to vector<8xi32>
    %8 = vector.shape_cast %7 : vector<8xi32> to vector<8x1xi32>
    %9 = vector.broadcast %8 : vector<8x1xi32> to vector<8x32xi32>
    %10 = arith.cmpi eq, %0, %9 : vector<8x32xi32>
    %11 = arith.ori %5, %10 : vector<8x32xi1>
    %c0_2 = arith.constant 0 : index
    %c2 = arith.constant 2 : index
    %12 = vector.load %arg1[%c0_2, %c2] : memref<8x3xi32, #tpu.memory_space<vmem>>, vector<8x1xi32>
    %13 = vector.shape_cast %12 : vector<8x1xi32> to vector<8xi32>
    %14 = vector.shape_cast %13 : vector<8xi32> to vector<8x1xi32>
    %15 = vector.broadcast %14 : vector<8x1xi32> to vector<8x32xi32>
    %16 = arith.cmpi eq, %0, %15 : vector<8x32xi32>
    %17 = arith.ori %11, %16 : vector<8x32xi1>
    %18 = arith.extui %17 : vector<8x32xi1> to vector<8x32xi32>
    %19 = arith.sitofp %18 : vector<8x32xi32> to vector<8x32xf32>
    %c0_3 = arith.constant 0 : index
    %c0_4 = arith.constant 0 : index
    %20 = vector.load %arg2[%c0_3, %c0_4] : memref<32x128xf32, #tpu.memory_space<vmem>>, vector<32x128xf32>
    %cst = arith.constant dense<0.000000e+00> : vector<8x128xf32>
    %21 = tpu.matmul %19, %20, %cst {dimension_numbers = #tpu.dot_dimension_numbers<[1], [0], [0], [1], [0, 0, 1, 1], [], []>} : vector<8x32xf32>, vector<32x128xf32>, vector<8x128xf32> -> vector<8x128xf32>
    %c0_5 = arith.constant 0 : index
    %c0_6 = arith.constant 0 : index
    %22 = vector.load %arg3[%c0_5, %c0_6] : memref<1x128xf32, #tpu.memory_space<vmem>>, vector<1x128xf32>
    %23 = vector.broadcast %22 : vector<1x128xf32> to vector<8x128xf32>
    %24 = arith.addf %21, %23 : vector<8x128xf32>
    %c0_7 = arith.constant 0 : index
    %c0_8 = arith.constant 0 : index
    %25 = vector.load %arg4[%c0_7, %c0_8] : memref<128x128xf32, #tpu.memory_space<vmem>>, vector<128x128xf32>
    %cst_9 = arith.constant dense<0.000000e+00> : vector<8x128xf32>
    %26 = tpu.matmul %24, %25, %cst_9 {dimension_numbers = #tpu.dot_dimension_numbers<[1], [0], [0], [1], [0, 0, 1, 1], [], []>} : vector<8x128xf32>, vector<128x128xf32>, vector<8x128xf32> -> vector<8x128xf32>
    %c0_10 = arith.constant 0 : index
    %c0_11 = arith.constant 0 : index
    %27 = vector.load %arg5[%c0_10, %c0_11] : memref<1x128xf32, #tpu.memory_space<vmem>>, vector<1x128xf32>
    %28 = vector.broadcast %27 : vector<1x128xf32> to vector<8x128xf32>
    %29 = arith.addf %26, %28 : vector<8x128xf32>
    %30 = math.tanh %29 : vector<8x128xf32>
    %c0_12 = arith.constant 0 : index
    %c0_13 = arith.constant 0 : index
    %31 = vector.load %arg6[%c0_12, %c0_13] : memref<8x128xf32, #tpu.memory_space<vmem>>, vector<8x128xf32>
    tpu.vector_store %arg6[%c0_12, %c0_13], %30 {strides = array<i32>} : memref<8x128xf32, #tpu.memory_space<vmem>>, vector<8x128xf32>,
    return
  }
  func.func @transform_0(%arg0: i32) -> (i32, i32) {
    %c0_i32 = arith.constant 0 : i32
    %c0_i32_0 = arith.constant 0 : i32
    return %arg0, %c0_i32 : i32, i32
  }
  func.func @transform_1(%arg0: i32) -> (i32, i32) {
    %c0_i32 = arith.constant 0 : i32
    %c0_i32_0 = arith.constant 0 : i32
    %c0_i32_1 = arith.constant 0 : i32
    return %c0_i32, %c0_i32_0 : i32, i32
  }
  func.func @transform_2(%arg0: i32) -> (i32, i32) {
    %c0_i32 = arith.constant 0 : i32
    %c0_i32_0 = arith.constant 0 : i32
    %c0_i32_1 = arith.constant 0 : i32
    return %c0_i32, %c0_i32_0 : i32, i32
  }
  func.func @transform_3(%arg0: i32) -> (i32, i32) {
    %c0_i32 = arith.constant 0 : i32
    %c0_i32_0 = arith.constant 0 : i32
    %c0_i32_1 = arith.constant 0 : i32
    return %c0_i32, %c0_i32_0 : i32, i32
  }
  func.func @transform_4(%arg0: i32) -> (i32, i32) {
    %c0_i32 = arith.constant 0 : i32
    %c0_i32_0 = arith.constant 0 : i32
    %c0_i32_1 = arith.constant 0 : i32
    return %c0_i32, %c0_i32_0 : i32, i32
  }
  func.func @transform_5(%arg0: i32) -> (i32, i32) {
    %c0_i32 = arith.constant 0 : i32
    %c0_i32_0 = arith.constant 0 : i32
    return %arg0, %c0_i32 : i32, i32
  }
}

</mosaic_0001>

<bundles_post_ra>
// kernel: _forward_onehot.1
= control target key start
LH: loop header
LB: loop body
LE: loop exit
PB: predicated region body
PF: predicated region fallthrough
CT: control target
= control target key end

     0   :  { %10 = vsyncpa [#allocation3], 0  ;;  %s277_s0 = inlined_call_operand.vmem [shape: s32[8,3], index: 0, kind: input, shape index: {}]   ;;  %s278_s1 = inlined_call_operand.hbm [shape: f32[32,128], index: 1, kind: input, shape index: {}]   ;;  %s279_s2 = inlined_call_operand.vmem [shape: f32[1,128], index: 2, kind: input, shape index: {}]   ;;  %s280_s3 = inlined_call_operand.hbm [shape: f32[128,128], index: 3, kind: input, shape index: {}]   ;;  %s281_s4 = inlined_call_operand.vmem [shape: f32[1,128], index: 4, kind: input, shape index: {}]   ;;  %s282_s5 = inlined_call_operand.vmem [shape: f32[8,128], index: 5, kind: output, shape index: {}]  }
   0x1   :  { %s18_s20 = sshll.u32 %s278_s1, 4  ;;  %s19_s20 = int_to_ptr.hbm [resolvable:$true] %s18_s20 }
   0x2   :  { %11 = vsyncpa [#allocation5], 0  ;;  %s221_s21 = smov [#allocation2]   ;;  %s33_s25 = sshll.u32 %s280_s3, 4  ;;  %s34_s25 = int_to_ptr.hbm [resolvable:$true] %s33_s25 }
   0x3   :  { %s20_s22 = sshll.u32 %s221_s21, 4  ;;  %s222_s26 = smov 128   ;;  %s21_s22 = int_to_ptr.vmem [resolvable:$true] %s20_s22 }
   0x4   :  { %s223_s27 = smov 8   ;;  %s224_s28 = smov [#allocation4]  }
   0x5   :  { %26 = dma.hbm_to_vmem [thread:$0]  %s19_s20, 512, %s21_s22, [#allocation3], %s222_s26, %s222_s26, %s223_s27  }
   0x6   :  { %s35_s29 = sshll.u32 %s224_s28, 4  ;;  %s36_s29 = int_to_ptr.vmem [resolvable:$true] %s35_s29 }
   0x7   :  { %41 = dma.hbm_to_vmem [thread:$0]  %s34_s25, 2048, %s36_s29, [#allocation5], %s222_s26, %s222_s26, %s223_s27  }
   0x8   :  { %217 = dma.done.wait [#allocation3], 512  }
   0x9   :  { %218 = vsyncadd [#allocation3], 4294966784 }
   0xa   :  { %219 = dma.done.wait [#allocation5], 2048  }
   0xb   :  { %220 = vsyncadd [#allocation5], 4294965248  ;;  %v225_v0 = vmov 0   ;;  %v226_v1 = vmov 2   ;;  %v54_v2 = vld [vmem:[%s277_s0] sm:$0xff]  ;;  %v227_v3 = vmov 1   ;;  %v52_v20 = vlaneseq }
   0xc   :  { %161 = vset.pattern.permute.xlu0 %v225_v0  ;;  %163 = vset.pattern.permute.xlu1 %v226_v1  ;;  %v74_v4 = vld [vmem:[#allocation2 + $0x18] sm:$0xff]  ;;  %v73_v5 = vld [vmem:[#allocation2 + $0x10] sm:$0xff]  ;;  %v72_v6 = vld [vmem:[#allocation2 + $0x8] sm:$0xff]  ;;  %vm79_vm4 = vcmask 261120   ;;  %v228_v27 = vmov 0.0  }
   0xd   :  { %56 = vperm.xlu0 %161, %v54_v2   ;;  %65 = vperm.xlu1 %163, %v54_v2   ;;  %v71_v7 = vld [vmem:[#allocation2] sm:$0xff]  ;;  %v118_v8 = vld [vmem:[#allocation4 + $0x78] sm:$0xff]  ;;  %v117_v9 = vld [vmem:[#allocation4 + $0x70] sm:$0xff]  ;;  %v53_v23 = vand.u32 127, %v52_v20 }
   0xe   :  { %95 = vmatpush.msra.mxu0 %v74_v4  ;;  %123 = vmatpush.msra.mxu1 %v118_v8  ;;  %v116_v10 = vld [vmem:[#allocation4 + $0x68] sm:$0xff]  ;;  %v115_v11 = vld [vmem:[#allocation4 + $0x60] sm:$0xff]  ;;  %v114_v12 = vld [vmem:[#allocation4 + $0x58] sm:$0xff] }
   0xf   :  { %v113_v13 = vld [vmem:[#allocation4 + $0x50] sm:$0xff]  ;;  %v112_v14 = vld [vmem:[#allocation4 + $0x48] sm:$0xff]  ;;  %v111_v15 = vld [vmem:[#allocation4 + $0x40] sm:$0xff] }
  0x10   :  { %96 = vmatpush.msra.mxu0 %v73_v5  ;;  %124 = vmatpush.msra.mxu1 %v117_v9  ;;  %v110_v16 = vld [vmem:[#allocation4 + $0x38] sm:$0xff]  ;;  %v109_v17 = vld [vmem:[#allocation4 + $0x30] sm:$0xff]  ;;  %v108_v19 = vld [vmem:[#allocation4 + $0x28] sm:$0xff] }
  0x11   :  { %v107_v21 = vld [vmem:[#allocation4 + $0x20] sm:$0xff]  ;;  %v106_v22 = vld [vmem:[#allocation4 + $0x18] sm:$0xff]  ;;  %v105_v25 = vld [vmem:[#allocation4 + $0x10] sm:$0xff] }
  0x12   :  { %97 = vmatpush.msra.mxu0 %v72_v6  ;;  %125 = vmatpush.msra.mxu1 %v116_v10  ;;  %v104_v29 = vld [vmem:[#allocation4 + $0x8] sm:$0xff]  ;;  %v103_v30 = vld [vmem:[#allocation4] sm:$0xff] }
  0x13   :  { %v165_v31 = vld [vmem:[%s279_s2] ss:$0 sm:$0xff] }
  0x14   :  { %98 = vmatpush.msra.mxu0 %v71_v7  ;;  %126 = vmatpush.msra.mxu1 %v115_v11  ;;  %v166_v34 = vld [vmem:[%s281_s4] ss:$0 sm:$0xff] }
  0x15   :  { %162 = vset.pattern.permute.xlu0 %v227_v3 }
  0x16   :  { %60 = vperm.xlu0 %162, %v54_v2   ;;  %127 = vmatpush.msra.mxu1 %v114_v12 }
  0x18   :  { %128 = vmatpush.msra.mxu1 %v113_v13 }
  0x1a   :  { %129 = vmatpush.msra.mxu1 %v112_v14 }
  0x1c   :  { %130 = vmatpush.msra.mxu1 %v111_v15 }
  0x1e   :  { %164 = vset.pattern.permute.xlu0 %v226_v1  ;;  %131 = vmatpush.msra.mxu1 %v110_v16 }
  0x20   :  { %132 = vmatpush.msra.mxu1 %v109_v17 }
  0x22   :  { %133 = vmatpush.msra.mxu1 %v108_v19 }
  0x24   :  { %134 = vmatpush.msra.mxu1 %v107_v21 }
  0x26   :  { %135 = vmatpush.msra.mxu1 %v106_v22 }
  0x28   :  { %136 = vmatpush.msra.mxu1 %v105_v25 }
  0x2a   :  { %137 = vmatpush.msra.mxu1 %v104_v29 }
  0x2c   :  { %138 = vmatpush.msra.mxu1 %v103_v30 }
  0x7f   :  { %v57_v18 = vpop.permute.xlu0 %56  ;;  %v66_v24 = vpop.permute.xlu1 %65 }
  0x80   :  { %vm67_vm0 = vcmp.eq.s32.totalorder %v53_v23, %v66_v24  ;;  %vm58_vm1 = vcmp.eq.s32.totalorder %v53_v23, %v57_v18 }
  0x88   :  { %v61_v26 = vpop.permute.xlu0 %60 }
  0x89   :  { %vm62_vm2 = vcmp.eq.s32.totalorder %v53_v23, %v61_v26 }
  0x8a   :  { %vm63_vm3 = vmor %vm58_vm1, %vm62_vm2 }
  0x8b   :  { %vm68_vm5 = vmor %vm63_vm3, %vm67_vm0 }
  0x8c   :  { %v151_v28 = vsel %vm68_vm5, 1.0, %v228_v27 }
  0x8d   :  { %152 = vmatmul.msk.f32.vlgmr.msra.gmra.mxu0 %vm79_vm4, %v151_v28 }
 0x10a   :  { %v100_v32 = vpop.f32.mrf.mxu0 }
 0x10b   :  { %v101_v33 = vadd.f32 %v165_v31, %v100_v32 }
 0x10d   :  { %139 = vmatmul.f32.vlgmr.msra.gmra.mxu1 %v101_v33 }
 0x18a   :  { %v140_v35 = vpop.f32.mrf.mxu1 }
 0x18b   :  { %v141_v36 = vadd.f32 %v166_v34, %v140_v35 }
 0x18d   :  { %167 = vtanh.f32 %v141_v36 }
 0x193   :  { %v168_v37 = vpop.eup %167 }
 0x194   :  { %144 = vst [vmem:[%s282_s5] sm:$0xff] %v168_v37 }
 0x195   :  { %149 = vsyncpa [#allocation3], 1 }
 0x196   :  { %150 = vsyncpa [#allocation5], 1 }

</bundles_post_ra>
